<compile_context>
chip_gen: v5e
topology: v5e:2x2
jax: 0.10.0
libtpu: 0.0.40
codegen_flags: <defaults>
</compile_context>

<pallas_src>
import jax
import jax.numpy as jnp
from jax import lax
from jax.experimental import pallas as pl
from jax.experimental.pallas import tpu as pltpu

NEG_SLOPE = 0.01   # torch.nn.LeakyReLU default negative_slope
BN_EPS = 1e-5      # torch.nn.BatchNorm1d default eps


def _round_up(v, m):
    return ((v + m - 1) // m) * m


# ---------------------------------------------------------------------------
# Pallas kernel
# ---------------------------------------------------------------------------
def _make_kernel(TB, C_in, C_out, L, K, dilation, hp, Hl, has_ds, compute_dtype):
    """Fused TemporalBlock kernel for one (TB, C_in, L) batch block.

    Output position t needs the zero-padded activation at t + k*dilation - hp
    (the symmetric Chomp1d is folded into the tap shifts).  The activation is
    written once into a lane-aligned halo scratch; each tap is a lane-shifted
    load from it, fed to a small MXU matmul.
    """
    shifts = [k * dilation - hp for k in range(K)]

    def kernel(*refs):
        if has_ds:
            (x_ref, scale_ref, shift_ref, w_ref, b_ref, ds_ref,
             o_ref, pad_ref) = refs
        else:
            (x_ref, scale_ref, shift_ref, w_ref, b_ref,
             o_ref, pad_ref) = refs
            ds_ref = None

        # BatchNorm1d (folded running stats) + LeakyReLU over the whole block,
        # in f32 on the VPU, hoisted out of the per-batch loop.
        a = scale_ref[...] * x_ref[...] + shift_ref[...]       # (TB, C_in, L)
        a = jnp.where(a > 0, a, NEG_SLOPE * a).astype(compute_dtype)

        # Halo scratch: activation stored at lane-aligned offset Hl (one
        # unmasked store) + hp-wide zero slivers on both sides = conv zero
        # padding.  Everything read below is written here in the same step.
        if hp > 0:
            zhalo = jnp.zeros((TB, C_in, hp), compute_dtype)
            pad_ref[:, :, Hl - hp:Hl] = zhalo
            pad_ref[:, :, Hl + L:Hl + L + hp] = zhalo
        pad_ref[:, :, Hl:Hl + L] = a

        w = w_ref[...]                      # (K, C_out, C_in), compute_dtype
        bias = b_ref[...]                   # (C_out, 1), f32 (conv_b [+ ds_b])
        ds_w = ds_ref[...] if has_ds else None  # (C_out, C_in), f32

        # TODO(synk): for very large TB convert this static loop to a
        #             lax.fori_loop to bound live ranges; TB is capped small.
        for b in range(TB):
            # Dilated conv: K lane-shifted loads -> small MXU matmuls (f32 acc).
            s0 = shifts[0]
            conv = jnp.dot(w[0], pad_ref[b, :, Hl + s0:Hl + s0 + L],
                           preferred_element_type=jnp.float32)
            for k in range(1, K):
                s = shifts[k]
                conv = conv + jnp.dot(w[k], pad_ref[b, :, Hl + s:Hl + s + L],
                                      preferred_element_type=jnp.float32)
            # Residual in f32 (stays exact even when compute_dtype is bf16).
            x_b = x_ref[b]
            if has_ds:
                res = jnp.dot(ds_w, x_b, preferred_element_type=jnp.float32)
            else:
                res = x_b                    # identity (C_in == C_out)
            o_ref[b] = (conv + bias + res).astype(o_ref.dtype)   # lane-dense

    return kernel


# ---------------------------------------------------------------------------
# TB selection (generation-aware, VMEM-budgeted)
# ---------------------------------------------------------------------------
def _prefer_multi_step():
    """Keep >=2 grid steps on megacore chips (2 TensorCores share one grid)."""
    try:
        kind = jax.devices()[0].device_kind.lower()
    except Exception:
        return True  # conservative default: assume megacore
    # v5e / v6e expose a single TensorCore: one big step amortizes the
    # ~0.35us per-step overhead best.
    single_tc = any(t in kind for t in
                    ("v5e", "v5 lite", "v5lite", "v6e", "v6 lite", "v6lite"))
    return not single_tc


def _pick_tb(N, C_in, C_out, L, Wscr, compute_itemsize, multi_step):
    """Batch elements per grid step under an explicit VMEM working-set budget
    (double-buffered in/out blocks + halo scratch), capped so the unrolled
    per-batch loop stays small."""
    per_b = (2 * C_in * L * 4                 # double-buffered input block (f32)
             + 2 * C_out * L * 4              # double-buffered output block
             + C_in * Wscr * compute_itemsize)  # halo scratch
    budget = 12 << 20                         # headroom inside 32 MiB scoped VMEM
    cap = max(1, budget // max(per_b, 1))
    cap = min(cap, 16)
    best = 1
    for cand in range(1, N + 1):
        if N % cand:
            continue
        if cand > cap:
            break
        if multi_step and N >= 2 and N // cand < 2:
            continue                          # keep both TensorCores busy
        best = cand
    return best


# ---------------------------------------------------------------------------
# Wrapper
# ---------------------------------------------------------------------------
def temporal_block_pallas(x, params, *, kernel_size, stride, dilation, padding,
                          compute_dtype=jnp.float32, out_dtype=None):
    assert stride == 1, "TCN TemporalBlock residual add requires stride == 1"
    assert padding % 2 == 0, "this module's Chomp1d requires an even padding"
    assert padding == dilation * (kernel_size - 1), \
        "residual add requires padding == dilation * (kernel_size - 1)"

    N, C_in, L = x.shape
    W = params["conv_w"]                            # (C_out, C_in, K)
    C_out, _, K = W.shape
    hp = padding // 2
    has_ds = C_in != C_out
    out_dtype = x.dtype if out_dtype is None else out_dtype

    # Fold BatchNorm running stats into per-channel scale/shift (eval mode).
    scale = params["bn_gamma"] / jnp.sqrt(params["bn_rvar"] + BN_EPS)
    shift = params["bn_beta"] - params["bn_rmean"] * scale
    scale = scale.reshape(C_in, 1).astype(jnp.float32)
    shift = shift.reshape(C_in, 1).astype(jnp.float32)

    # Conv weights, tap-major (K, C_out, C_in), in compute_dtype for the MXU.
    w_kmaj = jnp.transpose(W, (2, 0, 1)).astype(compute_dtype)
    if has_ds:
        ds_w = params["ds_w"].reshape(C_out, C_in).astype(jnp.float32)
        bias = params["conv_b"] + params["ds_b"]    # ds bias folded in
    else:
        ds_w = None
        bias = params["conv_b"]
    bias = bias.reshape(C_out, 1).astype(jnp.float32)

    # Halo scratch geometry: activation at lane-aligned offset Hl, hp zero
    # columns each side for the conv's zero padding.
    Hl = _round_up(hp, 128) if hp > 0 else 0
    Wscr = Hl + _round_up(L + hp, 128)

    itemsize = jnp.dtype(compute_dtype).itemsize
    TB = _pick_tb(N, C_in, C_out, L, Wscr, itemsize, _prefer_multi_step())

    kernel = _make_kernel(TB, C_in, C_out, L, K, dilation, hp, Hl, has_ds,
                          compute_dtype)

    in_specs = [
        pl.BlockSpec((TB, C_in, L), lambda g: (g, 0, 0)),       # x
        pl.BlockSpec((C_in, 1), lambda g: (0, 0)),              # BN scale
        pl.BlockSpec((C_in, 1), lambda g: (0, 0)),              # BN shift
        pl.BlockSpec((K, C_out, C_in), lambda g: (0, 0, 0)),    # conv weight
        pl.BlockSpec((C_out, 1), lambda g: (0, 0)),             # bias
    ]
    inputs = [x, scale, shift, w_kmaj, bias]
    if has_ds:
        in_specs.append(pl.BlockSpec((C_out, C_in), lambda g: (0, 0)))
        inputs.append(ds_w)

    return pl.pallas_call(
        kernel,
        out_shape=jax.ShapeDtypeStruct((N, C_out, L), out_dtype),
        grid_spec=pltpu.PrefetchScalarGridSpec(
            num_scalar_prefetch=0,
            grid=(N // TB,),
            in_specs=in_specs,
            out_specs=pl.BlockSpec((TB, C_out, L), lambda g: (g, 0, 0)),
            scratch_shapes=[pltpu.VMEM((TB, C_in, Wscr), compute_dtype)],
        ),
        compiler_params=pltpu.CompilerParams(
            dimension_semantics=("parallel",),
            vmem_limit_bytes=32 << 20),
    )(*inputs)


# ---------------------------------------------------------------------------
# Pure-JAX reference (for correctness check)
# ---------------------------------------------------------------------------
def temporal_block_ref(x, params, *, kernel_size, stride, dilation, padding):
    L = x.shape[2]
    scale = params["bn_gamma"] / jnp.sqrt(params["bn_rvar"] + BN_EPS)
    shift = params["bn_beta"] - params["bn_rmean"] * scale
    a = scale[None, :, None] * x + shift[None, :, None]
    a = jnp.where(a > 0, a, NEG_SLOPE * a)
    out = lax.conv_general_dilated(
        a, params["conv_w"], window_strides=(stride,),
        padding=[(padding, padding)], rhs_dilation=(dilation,),
        dimension_numbers=("NCH", "OIH", "NCH"))
    out = out + params["conv_b"][None, :, None]
    hp = padding // 2
    out = out[:, :, hp:hp + L]                      # symmetric Chomp1d(padding)
    if "ds_w" in params:
        res = lax.conv_general_dilated(
            x, params["ds_w"], window_strides=(1,), padding=[(0, 0)],
            dimension_numbers=("NCH", "OIH", "NCH"))
        res = res + params["ds_b"][None, :, None]
    else:
        res = x
    return out + res


# ---------------------------------------------------------------------------
# Main
# ---------------------------------------------------------------------------
if __name__ == "__main__":
    def make_params(keys, C_in, C_out, K, with_ds):
        p = {
            "bn_gamma": jax.random.normal(keys[0], (C_in,), jnp.float32) * 0.5 + 1.0,
            "bn_beta": jax.random.normal(keys[1], (C_in,), jnp.float32) * 0.1,
            "bn_rmean": jax.random.normal(keys[2], (C_in,), jnp.float32) * 0.1,
            "bn_rvar": jnp.abs(jax.random.normal(keys[3], (C_in,), jnp.float32)) + 0.5,
            "conv_w": jax.random.normal(keys[4], (C_out, C_in, K), jnp.float32) * 0.2,
            "conv_b": jax.random.normal(keys[5], (C_out,), jnp.float32) * 0.1,
        }
        if with_ds:
            p["ds_w"] = jax.random.normal(keys[6], (C_out, C_in, 1), jnp.float32) * 0.2
            p["ds_b"] = jax.random.normal(keys[7], (C_out,), jnp.float32) * 0.1
        return p

    kernel_size, stride, dilation = 3, 1, 2
    padding = dilation * (kernel_size - 1)          # = 4 (even)

    # --- config 1: C_in != C_out -> 1x1-conv downsample residual -------------
    N, C_in, C_out, L = 2, 4, 8, 128
    keys = jax.random.split(jax.random.PRNGKey(0), 9)
    params = make_params(keys, C_in, C_out, kernel_size, with_ds=True)
    x = jax.random.normal(keys[8], (N, C_in, L), jnp.float32)

    ref = jax.block_until_ready(temporal_block_ref(
        x, params, kernel_size=kernel_size, stride=stride,
        dilation=dilation, padding=padding))

    out = jax.block_until_ready(temporal_block_pallas(
        x, params, kernel_size=kernel_size, stride=stride,
        dilation=dilation, padding=padding, compute_dtype=jnp.float32))
    assert out.shape == (N, C_out, L), out.shape
    assert jnp.allclose(out, ref, atol=1e-4, rtol=1e-4), \
        float(jnp.max(jnp.abs(out - ref)))

    # bf16-at-the-MXU path (residual stays f32): looser tolerance.
    out_bf16 = jax.block_until_ready(temporal_block_pallas(
        x, params, kernel_size=kernel_size, stride=stride,
        dilation=dilation, padding=padding, compute_dtype=jnp.bfloat16))
    assert jnp.allclose(out_bf16, ref, atol=5e-2, rtol=5e-2), \
        float(jnp.max(jnp.abs(out_bf16 - ref)))

    # --- config 2: C_in == C_out -> identity residual ------------------------
    N2, C2, L2 = 2, 8, 128
    keys2 = jax.random.split(jax.random.PRNGKey(1), 9)
    params2 = make_params(keys2, C2, C2, kernel_size, with_ds=False)
    x2 = jax.random.normal(keys2[8], (N2, C2, L2), jnp.float32)

    ref2 = jax.block_until_ready(temporal_block_ref(
        x2, params2, kernel_size=kernel_size, stride=stride,
        dilation=dilation, padding=padding))
    out2 = jax.block_until_ready(temporal_block_pallas(
        x2, params2, kernel_size=kernel_size, stride=stride,
        dilation=dilation, padding=padding, compute_dtype=jnp.float32))
    assert jnp.allclose(out2, ref2, atol=1e-4, rtol=1e-4), \
        float(jnp.max(jnp.abs(out2 - ref2)))

    print("KERNEL_OK")
</pallas_src>

<mosaic_0001>
module attributes {stable_mosaic.version = 11 : i64} {
  func.func @kernel(%arg0: i32, %arg1: memref<1x4x128xf32, #tpu.memory_space<vmem>>, %arg2: memref<4x1xf32, #tpu.memory_space<vmem>>, %arg3: memref<4x1xf32, #tpu.memory_space<vmem>>, %arg4: memref<3x8x4xf32, #tpu.memory_space<vmem>>, %arg5: memref<8x1xf32, #tpu.memory_space<vmem>>, %arg6: memref<8x4xf32, #tpu.memory_space<vmem>>, %arg7: memref<1x8x128xf32, #tpu.memory_space<vmem>>, %arg8: memref<1x4x384xf32, #tpu.memory_space<vmem>>) attributes {dimension_semantics = [#tpu.dimension_semantics<parallel>], iteration_bounds = array<i64: 2>, scalar_prefetch = 0 : i64, scratch_operands = 1 : i64, tpu.core_type = #tpu.core_type<tc>, window_params = [{transform_indices = @transform_0, window_bounds = array<i64: 1, 4, 128>}, {pipeline_mode = #tpu.pipeline_mode<synchronous>, transform_indices = @transform_1, window_bounds = array<i64: 4, 1>}, {pipeline_mode = #tpu.pipeline_mode<synchronous>, transform_indices = @transform_2, window_bounds = array<i64: 4, 1>}, {pipeline_mode = #tpu.pipeline_mode<synchronous>, transform_indices = @transform_3, window_bounds = array<i64: 3, 8, 4>}, {pipeline_mode = #tpu.pipeline_mode<synchronous>, transform_indices = @transform_4, window_bounds = array<i64: 8, 1>}, {pipeline_mode = #tpu.pipeline_mode<synchronous>, transform_indices = @transform_5, window_bounds = array<i64: 8, 4>}, {transform_indices = @transform_6, window_bounds = array<i64: 1, 8, 128>}]} {
    %c0 = arith.constant 0 : index
    %c0_0 = arith.constant 0 : index
    %0 = vector.load %arg2[%c0, %c0_0] : memref<4x1xf32, #tpu.memory_space<vmem>>, vector<4x1xf32>
    %c0_1 = arith.constant 0 : index
    %c0_2 = arith.constant 0 : index
    %c0_3 = arith.constant 0 : index
    %1 = vector.load %arg1[%c0_1, %c0_2, %c0_3] : memref<1x4x128xf32, #tpu.memory_space<vmem>>, vector<1x4x128xf32>
    %2 = vector.shape_cast %0 : vector<4x1xf32> to vector<1x4x1xf32>
    %3 = vector.broadcast %2 : vector<1x4x1xf32> to vector<1x4x128xf32>
    %4 = arith.mulf %3, %1 : vector<1x4x128xf32>
    %c0_4 = arith.constant 0 : index
    %c0_5 = arith.constant 0 : index
    %5 = vector.load %arg3[%c0_4, %c0_5] : memref<4x1xf32, #tpu.memory_space<vmem>>, vector<4x1xf32>
    %6 = vector.shape_cast %5 : vector<4x1xf32> to vector<1x4x1xf32>
    %7 = vector.broadcast %6 : vector<1x4x1xf32> to vector<1x4x128xf32>
    %8 = arith.addf %4, %7 : vector<1x4x128xf32>
    %cst = arith.constant 0.000000e+00 : f32
    %9 = vector.broadcast %cst : f32 to vector<1x4x128xf32>
    %10 = arith.cmpf ogt, %8, %9 : vector<1x4x128xf32>
    %cst_6 = arith.constant 0.00999999977 : f32
    %11 = vector.broadcast %cst_6 : f32 to vector<1x4x128xf32>
    %12 = arith.mulf %11, %8 : vector<1x4x128xf32>
    %13 = arith.select %10, %8, %12 : vector<1x4x128xi1>, vector<1x4x128xf32>
    %cst_7 = arith.constant 0.000000e+00 : f32
    %14 = vector.broadcast %cst_7 : f32 to vector<1x4x2xf32>
    %c0_8 = arith.constant 0 : index
    %c0_9 = arith.constant 0 : index
    %c126 = arith.constant 126 : index
    %15 = vector.load %arg8[%c0_8, %c0_9, %c126] : memref<1x4x384xf32, #tpu.memory_space<vmem>>, vector<1x4x2xf32>
    tpu.vector_store %arg8[%c0_8, %c0_9, %c126], %14 {strides = array<i32>} : memref<1x4x384xf32, #tpu.memory_space<vmem>>, vector<1x4x2xf32>,
    %c0_10 = arith.constant 0 : index
    %c0_11 = arith.constant 0 : index
    %c256 = arith.constant 256 : index
    %16 = vector.load %arg8[%c0_10, %c0_11, %c256] : memref<1x4x384xf32, #tpu.memory_space<vmem>>, vector<1x4x2xf32>
    tpu.vector_store %arg8[%c0_10, %c0_11, %c256], %14 {strides = array<i32>} : memref<1x4x384xf32, #tpu.memory_space<vmem>>, vector<1x4x2xf32>,
    %c0_12 = arith.constant 0 : index
    %c0_13 = arith.constant 0 : index
    %c128 = arith.constant 128 : index
    %17 = vector.load %arg8[%c0_12, %c0_13, %c128] : memref<1x4x384xf32, #tpu.memory_space<vmem>>, vector<1x4x128xf32>
    tpu.vector_store %arg8[%c0_12, %c0_13, %c128], %13 {strides = array<i32>} : memref<1x4x384xf32, #tpu.memory_space<vmem>>, vector<1x4x128xf32>,
    %c0_14 = arith.constant 0 : index
    %c0_15 = arith.constant 0 : index
    %c0_16 = arith.constant 0 : index
    %18 = vector.load %arg4[%c0_14, %c0_15, %c0_16] : memref<3x8x4xf32, #tpu.memory_space<vmem>>, vector<3x8x4xf32>
    %c0_17 = arith.constant 0 : index
    %c0_18 = arith.constant 0 : index
    %19 = vector.load %arg5[%c0_17, %c0_18] : memref<8x1xf32, #tpu.memory_space<vmem>>, vector<8x1xf32>
    %c0_19 = arith.constant 0 : index
    %c0_20 = arith.constant 0 : index
    %20 = vector.load %arg6[%c0_19, %c0_20] : memref<8x4xf32, #tpu.memory_space<vmem>>, vector<8x4xf32>
    %21 = vector.extract_strided_slice %18 {offsets = [0, 0, 0], sizes = [1, 8, 4], strides = [1, 1, 1]} : vector<3x8x4xf32> to vector<1x8x4xf32>
    %22 = vector.shape_cast %21 : vector<1x8x4xf32> to vector<8x4xf32>
    %c0_21 = arith.constant 0 : index
    %c0_22 = arith.constant 0 : index
    %c126_23 = arith.constant 126 : index
    %23 = vector.load %arg8[%c0_21, %c0_22, %c126_23] : memref<1x4x384xf32, #tpu.memory_space<vmem>>, vector<1x4x128xf32>
    %24 = vector.shape_cast %23 : vector<1x4x128xf32> to vector<4x128xf32>
    %cst_24 = arith.constant dense<0.000000e+00> : vector<8x128xf32>
    %25 = tpu.matmul %22, %24, %cst_24 {dimension_numbers = #tpu.dot_dimension_numbers<[1], [0], [0], [1], [0, 0, 1, 1], [], []>} : vector<8x4xf32>, vector<4x128xf32>, vector<8x128xf32> -> vector<8x128xf32>
    %26 = vector.extract_strided_slice %18 {offsets = [1, 0, 0], sizes = [1, 8, 4], strides = [1, 1, 1]} : vector<3x8x4xf32> to vector<1x8x4xf32>
    %27 = vector.shape_cast %26 : vector<1x8x4xf32> to vector<8x4xf32>
    %c0_25 = arith.constant 0 : index
    %c0_26 = arith.constant 0 : index
    %c128_27 = arith.constant 128 : index
    %28 = vector.load %arg8[%c0_25, %c0_26, %c128_27] : memref<1x4x384xf32, #tpu.memory_space<vmem>>, vector<1x4x128xf32>
    %29 = vector.shape_cast %28 : vector<1x4x128xf32> to vector<4x128xf32>
    %cst_28 = arith.constant dense<0.000000e+00> : vector<8x128xf32>
    %30 = tpu.matmul %27, %29, %cst_28 {dimension_numbers = #tpu.dot_dimension_numbers<[1], [0], [0], [1], [0, 0, 1, 1], [], []>} : vector<8x4xf32>, vector<4x128xf32>, vector<8x128xf32> -> vector<8x128xf32>
    %31 = arith.addf %25, %30 : vector<8x128xf32>
    %32 = vector.extract_strided_slice %18 {offsets = [2, 0, 0], sizes = [1, 8, 4], strides = [1, 1, 1]} : vector<3x8x4xf32> to vector<1x8x4xf32>
    %33 = vector.shape_cast %32 : vector<1x8x4xf32> to vector<8x4xf32>
    %c0_29 = arith.constant 0 : index
    %c0_30 = arith.constant 0 : index
    %c130 = arith.constant 130 : index
    %34 = vector.load %arg8[%c0_29, %c0_30, %c130] : memref<1x4x384xf32, #tpu.memory_space<vmem>>, vector<1x4x128xf32>
    %35 = vector.shape_cast %34 : vector<1x4x128xf32> to vector<4x128xf32>
    %cst_31 = arith.constant dense<0.000000e+00> : vector<8x128xf32>
    %36 = tpu.matmul %33, %35, %cst_31 {dimension_numbers = #tpu.dot_dimension_numbers<[1], [0], [0], [1], [0, 0, 1, 1], [], []>} : vector<8x4xf32>, vector<4x128xf32>, vector<8x128xf32> -> vector<8x128xf32>
    %37 = arith.addf %31, %36 : vector<8x128xf32>
    %c0_32 = arith.constant 0 : index
    %c0_33 = arith.constant 0 : index
    %c0_34 = arith.constant 0 : index
    %38 = vector.load %arg1[%c0_32, %c0_33, %c0_34] : memref<1x4x128xf32, #tpu.memory_space<vmem>>, vector<1x4x128xf32>
    %39 = vector.shape_cast %38 : vector<1x4x128xf32> to vector<4x128xf32>
    %cst_35 = arith.constant dense<0.000000e+00> : vector<8x128xf32>
    %40 = tpu.matmul %20, %39, %cst_35 {dimension_numbers = #tpu.dot_dimension_numbers<[1], [0], [0], [1], [0, 0, 1, 1], [], []>} : vector<8x4xf32>, vector<4x128xf32>, vector<8x128xf32> -> vector<8x128xf32>
    %41 = vector.broadcast %19 : vector<8x1xf32> to vector<8x128xf32>
    %42 = arith.addf %37, %41 : vector<8x128xf32>
    %43 = arith.addf %42, %40 : vector<8x128xf32>
    %c0_36 = arith.constant 0 : index
    %c0_37 = arith.constant 0 : index
    %c0_38 = arith.constant 0 : index
    %44 = vector.load %arg7[%c0_36, %c0_37, %c0_38] : memref<1x8x128xf32, #tpu.memory_space<vmem>>, vector<1x8x128xf32>
    %45 = vector.shape_cast %44 : vector<1x8x128xf32> to vector<8x128xf32>
    %46 = vector.shape_cast %43 : vector<8x128xf32> to vector<1x8x128xf32>
    tpu.vector_store %arg7[%c0_36, %c0_37, %c0_38], %46 {strides = array<i32>} : memref<1x8x128xf32, #tpu.memory_space<vmem>>, vector<1x8x128xf32>,
    return
  }
  func.func @transform_0(%arg0: i32) -> (i32, i32, i32) {
    %c0_i32 = arith.constant 0 : i32
    %c0_i32_0 = arith.constant 0 : i32
    %c0_i32_1 = arith.constant 0 : i32
    return %arg0, %c0_i32, %c0_i32_0 : i32, i32, i32
  }
  func.func @transform_1(%arg0: i32) -> (i32, i32) {
    %c0_i32 = arith.constant 0 : i32
    %c0_i32_0 = arith.constant 0 : i32
    %c0_i32_1 = arith.constant 0 : i32
    return %c0_i32, %c0_i32_0 : i32, i32
  }
  func.func @transform_2(%arg0: i32) -> (i32, i32) {
    %c0_i32 = arith.constant 0 : i32
    %c0_i32_0 = arith.constant 0 : i32
    %c0_i32_1 = arith.constant 0 : i32
    return %c0_i32, %c0_i32_0 : i32, i32
  }
  func.func @transform_3(%arg0: i32) -> (i32, i32, i32) {
    %c0_i32 = arith.constant 0 : i32
    %c0_i32_0 = arith.constant 0 : i32
    %c0_i32_1 = arith.constant 0 : i32
    %c0_i32_2 = arith.constant 0 : i32
    return %c0_i32, %c0_i32_0, %c0_i32_1 : i32, i32, i32
  }
  func.func @transform_4(%arg0: i32) -> (i32, i32) {
    %c0_i32 = arith.constant 0 : i32
    %c0_i32_0 = arith.constant 0 : i32
    %c0_i32_1 = arith.constant 0 : i32
    return %c0_i32, %c0_i32_0 : i32, i32
  }
  func.func @transform_5(%arg0: i32) -> (i32, i32) {
    %c0_i32 = arith.constant 0 : i32
    %c0_i32_0 = arith.constant 0 : i32
    %c0_i32_1 = arith.constant 0 : i32
    return %c0_i32, %c0_i32_0 : i32, i32
  }
  func.func @transform_6(%arg0: i32) -> (i32, i32, i32) {
    %c0_i32 = arith.constant 0 : i32
    %c0_i32_0 = arith.constant 0 : i32
    %c0_i32_1 = arith.constant 0 : i32
    return %arg0, %c0_i32, %c0_i32_0 : i32, i32, i32
  }
}

</mosaic_0001>

<bundles_post_ra>
// kernel: tpu_custom_call.1
= control target key start
LH: loop header
LB: loop body
LE: loop exit
PB: predicated region body
PF: predicated region fallthrough
CT: control target
= control target key end

     0   :  { %11 = vsyncpa [#allocation4], 0  ;;  %s766_s0 = inlined_call_operand.vmem [shape: f32[2,4,128], index: 0, kind: input, shape index: {}]   ;;  %s767_s1 = inlined_call_operand.vmem [shape: f32[4,1], index: 1, kind: input, shape index: {}]   ;;  %s768_s2 = inlined_call_operand.vmem [shape: f32[4,1], index: 2, kind: input, shape index: {}]   ;;  %s769_s3 = inlined_call_operand.vmem [shape: f32[3,8,4], index: 3, kind: input, shape index: {}]   ;;  %s770_s4 = inlined_call_operand.vmem [shape: f32[8,1], index: 4, kind: input, shape index: {}]   ;;  %s771_s5 = inlined_call_operand.vmem [shape: f32[8,4], index: 5, kind: input, shape index: {}]   ;;  %s772_s6 = inlined_call_operand.hbm [shape: f32[2,8,128], index: 6, kind: output, shape index: {}]  }
   0x1   :  { %13 = vsyncpa [#allocation4 + $0x1], 0  ;;  %s652_s21 = smov 0   ;;  %s654_s22 = smov 0  }
   0x2   :  { %s656_s23 = smov 0   ;;  %s658_s24 = smov 0  }
   0x3 LB: > { %s673_s25 = sadd.s32 4294967295, %s611_s24   ;;  %s487_s26 = sadd.s32 4294967294, %s611_s24   ;;  %s611_s24 = sphi %s658_s24, %s778_s24   ;;  %s607_s23 = sphi %s656_s23, %s777_s23   ;;  %s603_s22 = sphi %s654_s22, %s776_s22   ;;  %s599_s21 = sphi %s652_s21, %s775_s21  }
   0x4   : > { %s677_s27 = sadd.s32 1, %s611_s24   ;;  %s157_s28 = sadd.s32 1, %s607_s23 }
   0x5   : > { %s154_s29 = ssub.s32 %s611_s24, %s677_s27  ;;  %p167_p0 = scmp.ne.s32.totalorder %s607_s23, %s603_s22 }
   0x6   : > { %p155_p1 = scmp.eq.s32.totalorder %s154_s29, 0  ;;  %p168_p2 = scmp.eq.s32.totalorder %s673_s25, 1 }
   0x7   : > { %p173_p3 = scmp.ne.s32.totalorder %s603_s22, %s599_s21  ;;  %p174_p4 = scmp.eq.s32.totalorder %s487_s26, 1 }
   0x8   : > { %s688_s30 = scalar_select %p155_p1, %s607_s23, %s157_s28  }
   0x9   : > { %p690_p5 = por %p168_p2, %p167_p0  ;;  %p694_p6 = por %p174_p4, %p173_p3 }
   0xa   : > { %p490_p7 = scmp.ge.s32.totalorder %s611_s24, 1  ;;  %p214_p8 = scmp.lt.s32.totalorder %s611_s24, 3 }
   0xc   : > { %p215_p9 = pnand %p490_p7, %p214_p8 }
   0xd   : > { %p243_p10 = scmp.lt.s32.totalorder (!%p215_p9), %s673_s25, 1  ;;  %s615_s20 = smov (!%p215_p9), 2  }
   0xe   : > { %218 = sbr.rel (%p215_p9) target bundleno = 440 (0x1b8), region = 44  ;;  %s616_s26 = smov (!%p215_p9), 126  }
   0xf   : > { %s502_s17 = sshll.u32 (!%p215_p9), %s673_s25, 3  ;;  %s569_s13 = scalar_lea.hbm (!%p215_p9), %s772_s6, 16 }
  0x13   : > { %v247_v0 = vld [vmem:[%s767_s1] sm:$0xf]  ;;  %v613_v1 = vmov 0   ;;  %vm265_vm0 = vcmask 1044464   ;;  %vm267_vm1 = vcmask 11264   ;;  %v614_v4 = vmov 0.0  }
  0x14   : > { %548 = vset.pattern.permute.xlu0 %v613_v1  ;;  %v255_v2 = vld [vmem:[%s768_s2] sm:$0xf]  ;;  %266 = vst.msk [vmem:[#allocation2] sm:$0xf] %vm265_vm0, %v614_v4  ;;  %s244_s15 = scalar_select %p243_p10, %s673_s25, 1  ;;  %vm281_vm3 = vcmask 1043456  }
  0x15   : > { %251 = vperm.xlu0 %548, %v247_v0   ;;  %v273_v3 = vld [vmem:[%s770_s4] sm:$0xff]  ;;  %268 = vst.msk [vmem:[#allocation2 + $0x8] sm:$0xf] %vm267_vm1, %v614_v4  ;;  %vm313_vm4 = vcmask 15360   ;;  %vm277_vm5 = vcmask 31744   ;;  %v271_v23 = vld [vmem:[%s769_s3 + $0x8] sm:$0xff] }
  0x16   : > { %s492_s16 = sshll.u32 %s244_s15, 2  ;;  %v270_v24 = vld [vmem:[%s769_s3] sm:$0xff]  ;;  %vm349_vm6 = vcmask 1031168   ;;  %v272_v28 = vld [vmem:[%s769_s3 + $0x10] sm:$0xff]  ;;  %s240_s15 = sand.u32 1, %s603_s22  }
  0x17   : > { %s714_s19 = scalar_lea.vmem %s766_s0, %s492_s16  ;;  %v274_v25 = vld [vmem:[%s771_s5] sm:$0xff]  ;;  %s491_s16 = sshll.u32 %s240_s15, 3 }
  0x18   : > { %v248_v6 = vld [vmem:[%s714_s19] sm:$0xf]  ;;  %s413_s9 = scalar_lea.sflag [#allocation4], %s240_s15 }
  0x19   : > { %v377_v22 = vld [vmem:[%s714_s19] sm:$0xf] }
  0x1a   : > { %499 = vmatpush.msk.msra.mxu3 %vm281_vm3, %v377_v22 }
  0x1b   : > { %500 = vmatmul.msk.f32.vlgmr.msra.gmra.mxu3 %vm277_vm5, %v274_v25 }
  0x1d   : > { %258 = vperm.xlu0 %548, %v255_v2  }
  0x25   : > { %406 = vperm.xlu0 %548, %v273_v3  }
  0x87   : > { %v252_v5 = vpop.permute.xlu0 %251 }
  0x88   : > { %v254_v7 = vmul.f32 %v252_v5, %v248_v6 }
  0x8f   : > { %v259_v8 = vpop.permute.xlu0 %258 }
  0x90   : > { %v261_v9 = vadd.f32 %v259_v8, %v254_v7 }
  0x92   : > { %vm262_vm2 = vcmp.gt.f32.partialorder %v261_v9, 0.0  ;;  %v263_v10 = vmul.f32 0.01, %v261_v9 }
  0x94   : > { %v264_v11 = vsel %vm262_vm2, %v261_v9, %v263_v10 }
  0x95   : > { %269 = vst [vmem:[#allocation2 + $0x4] sm:$0xf] %v264_v11 }
  0x97   : > { %v407_v35 = vpop.permute.xlu0 %406 }
  0x9c   : > { %v276_v12 = vld [vmem:[#allocation2 + $0x4] sm:$0xf] }
  0x9d   : > { %v275_v13 = vld [vmem:[#allocation2] sm:$0xff]  ;;  %493 = vmatpush.msk.msra.mxu0 %vm281_vm3, %v276_v12 }
  0x9e   : > { %306 = vst [vmem:[#allocation1] ss:$2 sm:$0xff] %v275_v13  ;;  %v340_v14 = vld [vmem:[#allocation2 + $0x4] sm:$0xff]  ;;  %494 = vmatmul.msk.f32.vlgmr.msra.gmra.mxu0 %vm277_vm5, %v271_v23  ;;  %v401_v36 = vpop.f32.mrf.mxu3 }
  0xa5   : > { %v307_v15 = vld.sshfl [vmem:[#allocation1] sm:$0xff pattern:$0x75316420]  ;;  %v308_v16 = vld.sshfl [vmem:[#allocation1 + $0x8] sm:$0xff pattern:$0x75316420] }
  0xa6   : > { %309 = vrot.lane.b32.xlu2 %v307_v15, %s615_s20  ;;  %342 = vst [vmem:[#allocation1] ss:$2 sm:$0xff] %v340_v14 }
  0xad   : > { %v343_v17 = vld.sshfl [vmem:[#allocation1] sm:$0xff pattern:$0x75316420]  ;;  %v344_v18 = vld.sshfl [vmem:[#allocation1 + $0x8] sm:$0xff pattern:$0x75316420] }
  0xae   : > { %311 = vrot.lane.b32.xlu2 %v308_v16, %s615_s20  ;;  %345 = vrot.lane.b32.xlu1 %v343_v17, %s616_s26  ;;  %s423_s20 = scalar_lea.hbm %s772_s6, %s502_s17 }
  0xaf   : > { %s427_s29 = sshll.u32 %s423_s20, 4  ;;  %s428_s29 = int_to_ptr.hbm [resolvable:$true] %s427_s29 }
  0xb0   : > { %s563_s25 = sshra.s32 %s428_s29, 4  ;;  %s564_s25 = int_to_ptr.hbm [resolvable:$true] %s563_s25 }
  0xb1   : > { %s565_s10 = scalar_lea.hbm %s564_s25, 8  ;;  %p570_p0 = scmp.lt.s32.totalorder %s564_s25, %s772_s6 }
  0xb2   : > { %p566_p11 = scmp.ne.s32.totalorder %s564_s25, %s565_s10  ;;  %p571_p1 = scmp.lt.s32.totalorder %s569_s13, %s565_s10 }
  0xb4   : > { %p567_p12 = pnand %p566_p11, %p690_p5  ;;  %p572_p2 = por %p571_p1, %p570_p0 }
  0xb6   : > { %347 = vrot.lane.b32.xlu1 %v344_v18, %s616_s26  ;;  %s242_s26 = scalar_lea.vmem [#allocation3], %s491_s16  ;;  %p568_p13 = pneg %p567_p12 }
  0xb7   : > { %s425_s28 = sshll.u32 %s242_s26, 4  ;;  %s426_s28 = int_to_ptr.vmem [resolvable:$true] %s425_s28 }
  0xb8   : > { %p573_p3 = pnand %p572_p2, %p568_p13 }
 0x100   : > { %v310_v19 = vpop.permute.xlu2 %309 }
 0x108   : > { %v312_v20 = vpop.permute.xlu2 %311 }
 0x109   : > { %v314_v21 = vsel %vm313_vm4, %v310_v19, %v312_v20 }
 0x10a   : > { %495 = vmatpush.msk.msra.mxu1 %vm281_vm3, %v314_v21 }
 0x10b   : > { %496 = vmatmul.msk.f32.vlgmr.msra.gmra.mxu1 %vm277_vm5, %v270_v24 }
 0x11b   : > { %v302_v30 = vpop.f32.mrf.mxu0 }
 0x120   : > { %v346_v26 = vpop.permute.xlu1 %345 }
 0x128   : > { %v348_v27 = vpop.permute.xlu1 %347 }
 0x129   : > { %v350_v29 = vsel %vm349_vm6, %v346_v26, %v348_v27 }
 0x12a   : > { %497 = vmatpush.msk.msra.mxu2 %vm281_vm3, %v350_v29 }
 0x12b   : > { %498 = vmatmul.msk.f32.vlgmr.msra.gmra.mxu2 %vm277_vm5, %v272_v28 }
 0x188   : > { %v337_v31 = vpop.f32.mrf.mxu1 }
 0x189   : > { %v338_v32 = vadd.f32 %v337_v31, %v302_v30 }
 0x1ae   : > { %v373_v33 = vpop.f32.mrf.mxu2 }
 0x1af   : > { %v376_v34 = vadd.f32 %v373_v33, %v338_v32 }
 0x1b1   : > { %v409_v37 = vadd.f32 %v407_v35, %v376_v34 }
 0x1b3   : > { %v410_v38 = vadd.f32 %v409_v37, %v401_v36 }
 0x1b5   : > { %411 = vst [vmem:[%s242_s26] sm:$0xff] %v410_v38 }
 0x1b6   : > { %576 = shalt.err (!%p573_p3)
}
 0x1b7   : > { %505 = dma.vmem_to_hbm [thread:$0]  (%p690_p5), %s426_s28, 128, %s428_s29, %s413_s9  }
 0x1b8 PF: > { %p511_p4 = scmp.ge.s32.totalorder %s611_s24, 2  ;;  %s439_s15 = sand.u32 1, %s599_s21  }
 0x1b9   : > { %s440_s17 = scalar_lea.sflag [#allocation4], %s439_s15 }
 0x1ba   : > { %p508_p7 = pnand %p511_p4, %p694_p6 }
 0x1bc   : > { %p509_p8 = pneg %p508_p7 }
 0x1be   : > { %594 = dma.done.wait (%p509_p8), %s440_s17, 128  }
 0x1bf   : > { %596 = vsyncadd (%p509_p8), %s440_s17, 4294967168  ;;  %p16_p9 = scmp.ge.s32.totalorder %s677_s27, 4   ;;  %s775_s21 = smov %s603_s22 }
 0x1c0   : > { %s776_s22 = smov %s607_s23  ;;  %s777_s23 = smov %s688_s30 }
 0x1c1   : > { %s778_s24 = smov %s677_s27  ;;  %18 = sbr.rel (!%p16_p9) target bundleno = 3 (0x3), region = 79 }
 0x1c6   :  { %446 = vsyncpa [#allocation4], 1 }
 0x1c7   :  { %448 = vsyncpa [#allocation4 + $0x1], 1 }

</bundles_post_ra>
